<compile_context>
chip_gen: v5e
topology: v5e:2x2
jax: 0.10.0
libtpu: 0.0.40
codegen_flags: <defaults>
</compile_context>

<pallas_src>
import jax
import jax.numpy as jnp
from jax.experimental import pallas as pl
from jax.experimental.pallas import tpu as pltpu


def _round_up(x, m):
    return ((x + m - 1) // m) * m


# ------------------------------ fused kernel ---------------------------------

def _make_decoder_kernel(n_layers, batch, emb_dim, hidden_dim, vocab):
    """Builds the fused decoder kernel for a fixed (static) configuration."""
    H = hidden_dim
    L = n_layers

    def kernel(*refs):
        # ---- unpack refs (inputs then outputs) -------------------------------
        tok_ref = refs[0]                            # VMEM [B, 1] int32
        state_ref = refs[1]                          # VMEM [B, 2*L*H] f32 (aliased)
        emb_ref = refs[2]                            # VMEM [V, E] bf16
        w_ih_refs = refs[3:3 + L]                    # VMEM [in_l, 4H] bf16
        w_hh_refs = refs[3 + L:3 + 2 * L]            # VMEM [H, 4H] bf16
        b_refs = refs[3 + 2 * L:3 + 3 * L]           # VMEM [1, 4H] f32 (b_ih+b_hh)
        fc_w_ref = refs[3 + 3 * L]                   # VMEM [H, Vp] bf16
        fc_b_ref = refs[4 + 3 * L]                   # VMEM [1, Vp] f32
        pred_ref = refs[5 + 3 * L]                   # VMEM [B, Vp] f32   (out)
        state_out_ref = refs[6 + 3 * L]              # VMEM [B, 2*L*H] f32 (out, aliased)

        # ---- embedding lookup as a one-hot matmul on the MXU ------------------
        # (no serial scalar gather; out-of-range ids select the all-zero row)
        tok = tok_ref[...]                                        # [B, 1] int32
        vocab_iota = jax.lax.broadcasted_iota(jnp.int32, (batch, vocab), 1)
        onehot = (vocab_iota == tok).astype(jnp.bfloat16)         # [B, V]
        x = jnp.dot(onehot, emb_ref[...],
                    preferred_element_type=jnp.float32)           # [B, E] f32
        # dropout on the embedding: module evaluated in eval mode -> identity.
        # TODO(synk): training-mode dropout (Bernoulli mask via pltpu.prng_*) not implemented.

        # ---- recurrent state, packed lane-dense [h_0..h_{L-1} | c_0..c_{L-1}] --
        state = state_ref[...]                                    # [B, 2*L*H] f32

        # Hoisted lane mask for a single-EUP-pass gate activation:
        #   sigmoid on i/f/o lanes, tanh on g lanes via tanh(x) = 2*sigmoid(2x)-1.
        lane = jax.lax.broadcasted_iota(jnp.int32, (batch, 4 * H), 1)
        is_g = (lane >= 2 * H) & (lane < 3 * H)
        g_scale = jnp.where(is_g, 2.0, 1.0).astype(jnp.float32)
        g_shift = jnp.where(is_g, -1.0, 0.0).astype(jnp.float32)

        x_b = x.astype(jnp.bfloat16)
        h_parts = []
        c_parts = []
        for l in range(L):
            h_prev = state[:, l * H:(l + 1) * H]                  # [B, H] f32
            c_prev = state[:, (L + l) * H:(L + l + 1) * H]        # [B, H] f32

            # two accumulating MXU dots instead of a runtime lane concat
            gates = (jnp.dot(x_b, w_ih_refs[l][...],
                             preferred_element_type=jnp.float32)
                     + jnp.dot(h_prev.astype(jnp.bfloat16), w_hh_refs[l][...],
                               preferred_element_type=jnp.float32)
                     + b_refs[l][...])                            # [B, 4H] f32

            # one sigmoid pass over the full 128-lane gate tile
            act = jax.nn.sigmoid(gates * g_scale) * g_scale + g_shift
            i_g = act[:, 0 * H:1 * H]
            f_g = act[:, 1 * H:2 * H]
            g_g = act[:, 2 * H:3 * H]
            o_g = act[:, 3 * H:4 * H]

            c_new = f_g * c_prev + i_g * g_g
            h_new = o_g * jnp.tanh(c_new)

            h_parts.append(h_new)
            c_parts.append(c_new)
            x_b = h_new.astype(jnp.bfloat16)   # inter-layer dropout = identity (eval)

        # ---- lane-dense outputs, each written exactly once ---------------------
        state_out_ref[...] = jnp.concatenate(h_parts + c_parts, axis=-1)
        pred_ref[...] = (jnp.dot(x_b, fc_w_ref[...],
                                 preferred_element_type=jnp.float32)
                         + fc_b_ref[...])

    return kernel


# ------------------------------ wrapper --------------------------------------

def decoder_forward(params, input_batch, initial_hidden, initial_cell):
    """Mirrors Decoder.forward (single decode step, eval mode).

    input_batch:    [B] int32 token ids        (PyTorch unsqueezes to [1, B])
    initial_hidden: [n_layers, B, H]
    initial_cell:   [n_layers, B, H]
    returns (prediction [B, V], hidden [n_layers, B, H], cell [n_layers, B, H])
    """
    B = input_batch.shape[0]
    L, _, H = initial_hidden.shape
    V, E = params["embedding"].shape
    Vp = params["fc_w_t"].shape[1]

    # Pack the recurrent state lane-dense: [B, 2*L*H] = [h_0..h_{L-1} | c_0..c_{L-1}]
    h_flat = jnp.transpose(initial_hidden, (1, 0, 2)).reshape(B, L * H)
    c_flat = jnp.transpose(initial_cell, (1, 0, 2)).reshape(B, L * H)
    state_in = jnp.concatenate([h_flat, c_flat], axis=-1).astype(jnp.float32)

    tok = input_batch.astype(jnp.int32).reshape(B, 1)

    kernel = _make_decoder_kernel(L, B, E, H, V)

    vmem = pl.BlockSpec(memory_space=pltpu.MemorySpace.VMEM)
    n_in = 3 + 3 * L + 2
    in_specs = [vmem] * n_in
    out_specs = (vmem, vmem)
    out_shape = (jax.ShapeDtypeStruct((B, Vp), jnp.float32),
                 jax.ShapeDtypeStruct((B, 2 * L * H), jnp.float32))

    args = ([tok, state_in, params["embedding"]]
            + [w_ih for (w_ih, _, _) in params["lstm"]]
            + [w_hh for (_, w_hh, _) in params["lstm"]]
            + [b for (_, _, b) in params["lstm"]]
            + [params["fc_w_t"], params["fc_b"]])

    pred_padded, state_out = pl.pallas_call(
        kernel,
        out_shape=out_shape,
        in_specs=in_specs,
        out_specs=out_specs,
        input_output_aliases={1: 1},   # recurrent state updated in place
    )(*args)

    prediction = pred_padded if Vp == V else pred_padded[:, :V]
    h_new = state_out[:, :L * H].reshape(B, L, H).transpose(1, 0, 2)
    c_new = state_out[:, L * H:].reshape(B, L, H).transpose(1, 0, 2)
    return prediction, h_new, c_new


# ------------------------- deterministic param init --------------------------

def init_params(key, output_dim, emb_dim, hidden_dim, n_layers):
    keys = jax.random.split(key, 3 + 4 * n_layers)
    bound = 1.0 / float(hidden_dim) ** 0.5
    vp = _round_up(output_dim, 128)            # lane-dense fc output

    params = {}
    params["embedding"] = jax.random.normal(
        keys[0], (output_dim, emb_dim), jnp.float32).astype(jnp.bfloat16)

    lstm = []
    for l in range(n_layers):
        in_dim = emb_dim if l == 0 else hidden_dim
        kw1, kw2, kb1, kb2 = keys[3 + 4 * l: 3 + 4 * (l + 1)]
        w_ih = jax.random.uniform(kw1, (4 * hidden_dim, in_dim),
                                  jnp.float32, -bound, bound)
        w_hh = jax.random.uniform(kw2, (4 * hidden_dim, hidden_dim),
                                  jnp.float32, -bound, bound)
        b_ih = jax.random.uniform(kb1, (4 * hidden_dim,),
                                  jnp.float32, -bound, bound)
        b_hh = jax.random.uniform(kb2, (4 * hidden_dim,),
                                  jnp.float32, -bound, bound)
        # Keep W_ih^T / W_hh^T separate (split accumulating dots in the kernel),
        # combine the two biases once at init.  Weights in bf16, f32 accumulation.
        lstm.append((w_ih.T.astype(jnp.bfloat16),
                     w_hh.T.astype(jnp.bfloat16),
                     (b_ih + b_hh)[None, :]))
    params["lstm"] = lstm

    fc_w = jax.random.uniform(keys[1], (output_dim, hidden_dim),
                              jnp.float32, -bound, bound)
    fc_b = jax.random.uniform(keys[2], (output_dim,),
                              jnp.float32, -bound, bound)
    fc_w_t = fc_w.T                    # [H, V]
    fc_b2 = fc_b[None, :]              # [1, V]
    if vp != output_dim:               # zero-pad vocab dim to a multiple of 128
        fc_w_t = jnp.pad(fc_w_t, ((0, 0), (0, vp - output_dim)))
        fc_b2 = jnp.pad(fc_b2, ((0, 0), (0, vp - output_dim)))
    params["fc_w_t"] = fc_w_t.astype(jnp.bfloat16)
    params["fc_b"] = fc_b2
    return params


# ------------------------- pure-JAX reference (f32) ---------------------------

def decoder_reference(params, input_batch, initial_hidden, initial_cell):
    emb = params["embedding"].astype(jnp.float32)
    V = emb.shape[0]
    x = emb[input_batch]                               # [B, E]
    h_list, c_list = [], []
    for l, (w_ih_t, w_hh_t, b) in enumerate(params["lstm"]):
        h_prev = initial_hidden[l]
        c_prev = initial_cell[l]
        H = h_prev.shape[-1]
        gates = (x @ w_ih_t.astype(jnp.float32)
                 + h_prev @ w_hh_t.astype(jnp.float32) + b[0])
        i = jax.nn.sigmoid(gates[:, :H])
        f = jax.nn.sigmoid(gates[:, H:2 * H])
        g = jnp.tanh(gates[:, 2 * H:3 * H])
        o = jax.nn.sigmoid(gates[:, 3 * H:])
        c = f * c_prev + i * g
        h = o * jnp.tanh(c)
        h_list.append(h)
        c_list.append(c)
        x = h
    pred = x @ params["fc_w_t"].astype(jnp.float32)[:, :V] + params["fc_b"][0, :V]
    return pred, jnp.stack(h_list), jnp.stack(c_list)


# ----------------------------------- main ------------------------------------

if __name__ == "__main__":
    OUTPUT_DIM = 128   # target vocab size (multiple of 128 -> lane-dense output)
    EMB_DIM = 32
    HIDDEN_DIM = 32
    N_LAYERS = 2
    BATCH = 8

    key = jax.random.PRNGKey(0)
    k_params, k_tok, k_h, k_c = jax.random.split(key, 4)

    params = init_params(k_params, OUTPUT_DIM, EMB_DIM, HIDDEN_DIM, N_LAYERS)

    input_batch = jax.random.randint(k_tok, (BATCH,), 0, OUTPUT_DIM, jnp.int32)
    initial_hidden = jax.random.normal(
        k_h, (N_LAYERS, BATCH, HIDDEN_DIM), jnp.float32)
    initial_cell = jax.random.normal(
        k_c, (N_LAYERS, BATCH, HIDDEN_DIM), jnp.float32)

    decoder_step = jax.jit(decoder_forward)
    prediction, hidden_state, cell_state = decoder_step(
        params, input_batch, initial_hidden, initial_cell)
    jax.block_until_ready((prediction, hidden_state, cell_state))

    assert prediction.shape == (BATCH, OUTPUT_DIM)
    assert hidden_state.shape == (N_LAYERS, BATCH, HIDDEN_DIM)
    assert cell_state.shape == (N_LAYERS, BATCH, HIDDEN_DIM)
    assert bool(jnp.all(jnp.isfinite(prediction)))

    # loose check vs a pure-JAX f32 reference (bf16 weights, f32 math)
    ref_pred, ref_h, ref_c = decoder_reference(
        params, input_batch, initial_hidden, initial_cell)
    assert float(jnp.max(jnp.abs(prediction - ref_pred))) < 5e-2
    assert float(jnp.max(jnp.abs(hidden_state - ref_h))) < 5e-2
    assert float(jnp.max(jnp.abs(cell_state - ref_c))) < 5e-2

    print("KERNEL_OK")
</pallas_src>

<mosaic_0001>
module attributes {stable_mosaic.version = 11 : i64} {
  func.func @kernel(%arg0: memref<8x1xi32, #tpu.memory_space<vmem>>, %arg1: memref<8x128xf32, #tpu.memory_space<vmem>>, %arg2: memref<128x32xbf16, #tpu.memory_space<vmem>>, %arg3: memref<32x128xbf16, #tpu.memory_space<vmem>>, %arg4: memref<32x128xbf16, #tpu.memory_space<vmem>>, %arg5: memref<32x128xbf16, #tpu.memory_space<vmem>>, %arg6: memref<32x128xbf16, #tpu.memory_space<vmem>>, %arg7: memref<1x128xf32, #tpu.memory_space<vmem>>, %arg8: memref<1x128xf32, #tpu.memory_space<vmem>>, %arg9: memref<32x128xbf16, #tpu.memory_space<vmem>>, %arg10: memref<1x128xf32, #tpu.memory_space<vmem>>, %arg11: memref<8x128xf32, #tpu.memory_space<vmem>>, %arg12: memref<8x128xf32, #tpu.memory_space<vmem>>) attributes {dimension_semantics = [], scalar_prefetch = 0 : i64, scratch_operands = 0 : i64, tpu.core_type = #tpu.core_type<tc>} {
    %c0 = arith.constant 0 : index
    %c0_0 = arith.constant 0 : index
    %0 = vector.load %arg0[%c0, %c0_0] : memref<8x1xi32, #tpu.memory_space<vmem>>, vector<8x1xi32>
    %1 = tpu.iota {dimensions = array<i32: 1>} : vector<8x128xi32>
    %2 = vector.broadcast %0 : vector<8x1xi32> to vector<8x128xi32>
    %3 = arith.cmpi eq, %1, %2 : vector<8x128xi32>
    %4 = arith.extui %3 : vector<8x128xi1> to vector<8x128xi32>
    %5 = arith.sitofp %4 : vector<8x128xi32> to vector<8x128xf32>
    %6 = arith.truncf %5 : vector<8x128xf32> to vector<8x128xbf16>
    %c0_1 = arith.constant 0 : index
    %c0_2 = arith.constant 0 : index
    %7 = vector.load %arg2[%c0_1, %c0_2] : memref<128x32xbf16, #tpu.memory_space<vmem>>, vector<128x32xbf16>
    %cst = arith.constant dense<0.000000e+00> : vector<8x32xf32>
    %8 = tpu.matmul %6, %7, %cst {dimension_numbers = #tpu.dot_dimension_numbers<[1], [0], [0], [1], [0, 0, 1, 1], [], []>} : vector<8x128xbf16>, vector<128x32xbf16>, vector<8x32xf32> -> vector<8x32xf32>
    %c0_3 = arith.constant 0 : index
    %c0_4 = arith.constant 0 : index
    %9 = vector.load %arg1[%c0_3, %c0_4] : memref<8x128xf32, #tpu.memory_space<vmem>>, vector<8x128xf32>
    %10 = tpu.iota {dimensions = array<i32: 1>} : vector<8x128xi32>
    %c64_i32 = arith.constant 64 : i32
    %11 = vector.broadcast %c64_i32 : i32 to vector<8x128xi32>
    %12 = arith.cmpi sge, %10, %11 : vector<8x128xi32>
    %c96_i32 = arith.constant 96 : i32
    %13 = vector.broadcast %c96_i32 : i32 to vector<8x128xi32>
    %14 = arith.cmpi slt, %10, %13 : vector<8x128xi32>
    %15 = arith.andi %12, %14 : vector<8x128xi1>
    %cst_5 = arith.constant 2.000000e+00 : f32
    %cst_6 = arith.constant 1.000000e+00 : f32
    %16 = vector.broadcast %cst_5 : f32 to vector<8x128xf32>
    %17 = vector.broadcast %cst_6 : f32 to vector<8x128xf32>
    %18 = arith.select %15, %16, %17 : vector<8x128xi1>, vector<8x128xf32>
    %cst_7 = arith.constant -1.000000e+00 : f32
    %cst_8 = arith.constant 0.000000e+00 : f32
    %19 = vector.broadcast %cst_7 : f32 to vector<8x128xf32>
    %20 = vector.broadcast %cst_8 : f32 to vector<8x128xf32>
    %21 = arith.select %15, %19, %20 : vector<8x128xi1>, vector<8x128xf32>
    %22 = arith.truncf %8 : vector<8x32xf32> to vector<8x32xbf16>
    %23 = vector.extract_strided_slice %9 {offsets = [0, 0], sizes = [8, 32], strides = [1, 1]} : vector<8x128xf32> to vector<8x32xf32>
    %24 = vector.extract_strided_slice %9 {offsets = [0, 64], sizes = [8, 32], strides = [1, 1]} : vector<8x128xf32> to vector<8x32xf32>
    %c0_9 = arith.constant 0 : index
    %c0_10 = arith.constant 0 : index
    %25 = vector.load %arg3[%c0_9, %c0_10] : memref<32x128xbf16, #tpu.memory_space<vmem>>, vector<32x128xbf16>
    %cst_11 = arith.constant dense<0.000000e+00> : vector<8x128xf32>
    %26 = tpu.matmul %22, %25, %cst_11 {dimension_numbers = #tpu.dot_dimension_numbers<[1], [0], [0], [1], [0, 0, 1, 1], [], []>} : vector<8x32xbf16>, vector<32x128xbf16>, vector<8x128xf32> -> vector<8x128xf32>
    %27 = arith.truncf %23 : vector<8x32xf32> to vector<8x32xbf16>
    %c0_12 = arith.constant 0 : index
    %c0_13 = arith.constant 0 : index
    %28 = vector.load %arg5[%c0_12, %c0_13] : memref<32x128xbf16, #tpu.memory_space<vmem>>, vector<32x128xbf16>
    %cst_14 = arith.constant dense<0.000000e+00> : vector<8x128xf32>
    %29 = tpu.matmul %27, %28, %cst_14 {dimension_numbers = #tpu.dot_dimension_numbers<[1], [0], [0], [1], [0, 0, 1, 1], [], []>} : vector<8x32xbf16>, vector<32x128xbf16>, vector<8x128xf32> -> vector<8x128xf32>
    %30 = arith.addf %26, %29 : vector<8x128xf32>
    %c0_15 = arith.constant 0 : index
    %c0_16 = arith.constant 0 : index
    %31 = vector.load %arg7[%c0_15, %c0_16] : memref<1x128xf32, #tpu.memory_space<vmem>>, vector<1x128xf32>
    %32 = vector.broadcast %31 : vector<1x128xf32> to vector<8x128xf32>
    %33 = arith.addf %30, %32 : vector<8x128xf32>
    %34 = arith.mulf %33, %18 : vector<8x128xf32>
    %35 = arith.negf %34 : vector<8x128xf32>
    %36 = math.exp %35 : vector<8x128xf32>
    %cst_17 = arith.constant 1.000000e+00 : f32
    %37 = vector.broadcast %cst_17 : f32 to vector<8x128xf32>
    %38 = arith.addf %37, %36 : vector<8x128xf32>
    %39 = arith.divf %37, %38 : vector<8x128xf32>
    %40 = arith.mulf %39, %18 : vector<8x128xf32>
    %41 = arith.addf %40, %21 : vector<8x128xf32>
    %42 = vector.extract_strided_slice %41 {offsets = [0, 0], sizes = [8, 32], strides = [1, 1]} : vector<8x128xf32> to vector<8x32xf32>
    %43 = vector.extract_strided_slice %41 {offsets = [0, 32], sizes = [8, 32], strides = [1, 1]} : vector<8x128xf32> to vector<8x32xf32>
    %44 = vector.extract_strided_slice %41 {offsets = [0, 64], sizes = [8, 32], strides = [1, 1]} : vector<8x128xf32> to vector<8x32xf32>
    %45 = vector.extract_strided_slice %41 {offsets = [0, 96], sizes = [8, 32], strides = [1, 1]} : vector<8x128xf32> to vector<8x32xf32>
    %46 = arith.mulf %43, %24 : vector<8x32xf32>
    %47 = arith.mulf %42, %44 : vector<8x32xf32>
    %48 = arith.addf %46, %47 : vector<8x32xf32>
    %49 = math.tanh %48 : vector<8x32xf32>
    %50 = arith.mulf %45, %49 : vector<8x32xf32>
    %51 = arith.truncf %50 : vector<8x32xf32> to vector<8x32xbf16>
    %52 = vector.extract_strided_slice %9 {offsets = [0, 32], sizes = [8, 32], strides = [1, 1]} : vector<8x128xf32> to vector<8x32xf32>
    %53 = vector.extract_strided_slice %9 {offsets = [0, 96], sizes = [8, 32], strides = [1, 1]} : vector<8x128xf32> to vector<8x32xf32>
    %c0_18 = arith.constant 0 : index
    %c0_19 = arith.constant 0 : index
    %54 = vector.load %arg4[%c0_18, %c0_19] : memref<32x128xbf16, #tpu.memory_space<vmem>>, vector<32x128xbf16>
    %cst_20 = arith.constant dense<0.000000e+00> : vector<8x128xf32>
    %55 = tpu.matmul %51, %54, %cst_20 {dimension_numbers = #tpu.dot_dimension_numbers<[1], [0], [0], [1], [0, 0, 1, 1], [], []>} : vector<8x32xbf16>, vector<32x128xbf16>, vector<8x128xf32> -> vector<8x128xf32>
    %56 = arith.truncf %52 : vector<8x32xf32> to vector<8x32xbf16>
    %c0_21 = arith.constant 0 : index
    %c0_22 = arith.constant 0 : index
    %57 = vector.load %arg6[%c0_21, %c0_22] : memref<32x128xbf16, #tpu.memory_space<vmem>>, vector<32x128xbf16>
    %cst_23 = arith.constant dense<0.000000e+00> : vector<8x128xf32>
    %58 = tpu.matmul %56, %57, %cst_23 {dimension_numbers = #tpu.dot_dimension_numbers<[1], [0], [0], [1], [0, 0, 1, 1], [], []>} : vector<8x32xbf16>, vector<32x128xbf16>, vector<8x128xf32> -> vector<8x128xf32>
    %59 = arith.addf %55, %58 : vector<8x128xf32>
    %c0_24 = arith.constant 0 : index
    %c0_25 = arith.constant 0 : index
    %60 = vector.load %arg8[%c0_24, %c0_25] : memref<1x128xf32, #tpu.memory_space<vmem>>, vector<1x128xf32>
    %61 = vector.broadcast %60 : vector<1x128xf32> to vector<8x128xf32>
    %62 = arith.addf %59, %61 : vector<8x128xf32>
    %63 = arith.mulf %62, %18 : vector<8x128xf32>
    %64 = arith.negf %63 : vector<8x128xf32>
    %65 = math.exp %64 : vector<8x128xf32>
    %cst_26 = arith.constant 1.000000e+00 : f32
    %66 = vector.broadcast %cst_26 : f32 to vector<8x128xf32>
    %67 = arith.addf %66, %65 : vector<8x128xf32>
    %68 = arith.divf %66, %67 : vector<8x128xf32>
    %69 = arith.mulf %68, %18 : vector<8x128xf32>
    %70 = arith.addf %69, %21 : vector<8x128xf32>
    %71 = vector.extract_strided_slice %70 {offsets = [0, 0], sizes = [8, 32], strides = [1, 1]} : vector<8x128xf32> to vector<8x32xf32>
    %72 = vector.extract_strided_slice %70 {offsets = [0, 32], sizes = [8, 32], strides = [1, 1]} : vector<8x128xf32> to vector<8x32xf32>
    %73 = vector.extract_strided_slice %70 {offsets = [0, 64], sizes = [8, 32], strides = [1, 1]} : vector<8x128xf32> to vector<8x32xf32>
    %74 = vector.extract_strided_slice %70 {offsets = [0, 96], sizes = [8, 32], strides = [1, 1]} : vector<8x128xf32> to vector<8x32xf32>
    %75 = arith.mulf %72, %53 : vector<8x32xf32>
    %76 = arith.mulf %71, %73 : vector<8x32xf32>
    %77 = arith.addf %75, %76 : vector<8x32xf32>
    %78 = math.tanh %77 : vector<8x32xf32>
    %79 = arith.mulf %74, %78 : vector<8x32xf32>
    %80 = arith.truncf %79 : vector<8x32xf32> to vector<8x32xbf16>
    %81 = tpu.concatenate %50, %79, %48, %77 in 1 : vector<8x32xf32>, vector<8x32xf32>, vector<8x32xf32>, vector<8x32xf32> -> vector<8x128xf32>
    %c0_27 = arith.constant 0 : index
    %c0_28 = arith.constant 0 : index
    %82 = vector.load %arg12[%c0_27, %c0_28] : memref<8x128xf32, #tpu.memory_space<vmem>>, vector<8x128xf32>
    tpu.vector_store %arg12[%c0_27, %c0_28], %81 {strides = array<i32>} : memref<8x128xf32, #tpu.memory_space<vmem>>, vector<8x128xf32>,
    %c0_29 = arith.constant 0 : index
    %c0_30 = arith.constant 0 : index
    %83 = vector.load %arg9[%c0_29, %c0_30] : memref<32x128xbf16, #tpu.memory_space<vmem>>, vector<32x128xbf16>
    %cst_31 = arith.constant dense<0.000000e+00> : vector<8x128xf32>
    %84 = tpu.matmul %80, %83, %cst_31 {dimension_numbers = #tpu.dot_dimension_numbers<[1], [0], [0], [1], [0, 0, 1, 1], [], []>} : vector<8x32xbf16>, vector<32x128xbf16>, vector<8x128xf32> -> vector<8x128xf32>
    %c0_32 = arith.constant 0 : index
    %c0_33 = arith.constant 0 : index
    %85 = vector.load %arg10[%c0_32, %c0_33] : memref<1x128xf32, #tpu.memory_space<vmem>>, vector<1x128xf32>
    %86 = vector.broadcast %85 : vector<1x128xf32> to vector<8x128xf32>
    %87 = arith.addf %84, %86 : vector<8x128xf32>
    %c0_34 = arith.constant 0 : index
    %c0_35 = arith.constant 0 : index
    %88 = vector.load %arg11[%c0_34, %c0_35] : memref<8x128xf32, #tpu.memory_space<vmem>>, vector<8x128xf32>
    tpu.vector_store %arg11[%c0_34, %c0_35], %87 {strides = array<i32>} : memref<8x128xf32, #tpu.memory_space<vmem>>, vector<8x128xf32>,
    return
  }
}

</mosaic_0001>

<bundles_post_ra>
// kernel: decoder_forward.1
= control target key start
LH: loop header
LB: loop body
LE: loop exit
PB: predicated region body
PF: predicated region fallthrough
CT: control target
= control target key end

     0   :  { %v601_v2 = vmov 0   ;;  %s792_s0 = inlined_call_operand.vmem [shape: s32[8,1], index: 0, kind: input, shape index: {}]   ;;  %s793_s1 = inlined_call_operand.vmem [shape: f32[8,128], index: 1, kind: input, shape index: {}, may-alias: {1,12}]   ;;  %s794_s2 = inlined_call_operand.vmem [shape: bf16[128,32], index: 2, kind: input, shape index: {}]   ;;  %s795_s3 = inlined_call_operand.vmem [shape: bf16[32,128], index: 3, kind: input, shape index: {}]   ;;  %s796_s4 = inlined_call_operand.vmem [shape: bf16[32,128], index: 4, kind: input, shape index: {}]   ;;  %s797_s5 = inlined_call_operand.vmem [shape: bf16[32,128], index: 5, kind: input, shape index: {}]   ;;  %s798_s6 = inlined_call_operand.vmem [shape: bf16[32,128], index: 6, kind: input, shape index: {}]   ;;  %s799_s7 = inlined_call_operand.vmem [shape: f32[1,128], index: 7, kind: input, shape index: {}]   ;;  %s800_s8 = inlined_call_operand.vmem [shape: f32[1,128], index: 8, kind: input, shape index: {}]   ;;  %s801_s9 = inlined_call_operand.vmem [shape: bf16[32,128], index: 9, kind: input, shape index: {}]   ;;  %s802_s10 = inlined_call_operand.vmem [shape: f32[1,128], index: 10, kind: input, shape index: {}]   ;;  %s803_s11 = inlined_call_operand.hbm [shape: f32[8,128], index: 11, kind: output, shape index: {0}]   ;;  %s804_s12 = inlined_call_operand.vmem [shape: f32[8,128], index: 12, kind: output, shape index: {1}, may-alias: {1,12}]  }
   0x1   :  { %v42_v0 = vld [vmem:[%s792_s0] sm:$0xff]  ;;  %v540_v1 = vld [vmem:[%s794_s2 + $0x38] sm:$0xff]  ;;  %559 = vset.pattern.permute.xlu0 %v601_v2  ;;  %v539_v3 = vld [vmem:[%s794_s2 + $0x30] sm:$0xff] }
   0x2   :  { %46 = vperm.xlu0 %559, %v42_v0   ;;  %116 = vmatpush.bf16.msra.mxu0 %v540_v1 }
   0x3   :  { %18 = vsyncpa [#allocation3], 0  ;;  %v538_v4 = vld [vmem:[%s794_s2 + $0x28] sm:$0xff]  ;;  %v537_v5 = vld [vmem:[%s794_s2 + $0x20] sm:$0xff]  ;;  %v43_v13 = vlaneseq  ;;  %v602_v16 = vmov 1.0|1.0  }
   0x4   :  { %v536_v6 = vld [vmem:[%s794_s2 + $0x18] sm:$0xff]  ;;  %v535_v7 = vld [vmem:[%s794_s2 + $0x10] sm:$0xff]  ;;  %v534_v8 = vld [vmem:[%s794_s2 + $0x8] sm:$0xff]  ;;  %s603_s0 = smov 96   ;;  %vm157_vm2 = vcmask 261120   ;;  %v604_v29 = vmov 1.0  }
   0x5   :  { %v533_v9 = vld [vmem:[%s794_s2] sm:$0xff]  ;;  %v544_v10 = vld [vmem:[%s797_s5 + $0x8] sm:$0xff]  ;;  %v44_v14 = vand.u32 127, %v43_v13  ;;  %v605_v46 = vmov 0.0   ;;  %vm386_vm14 = vcmask 523264   ;;  %vm388_vm15 = vcmask 785408  }
   0x6   :  { %117 = vmatpush.bf16.msra.mxu0 %v539_v3  ;;  %v542_v11 = vld [vmem:[%s795_s3 + $0x8] sm:$0xff]  ;;  %167 = vmatpush.bf16.msra.mxu1 %v544_v10  ;;  %v543_v12 = vld [vmem:[%s797_s5] sm:$0xff]  ;;  %s606_s5 = smov 64   ;;  %s608_s25 = smov [#allocation2]  }
   0x7   :  { %195 = vmatpush.bf16.msra.mxu2 %v542_v11  ;;  %v541_v17 = vld [vmem:[%s795_s3] sm:$0xff]  ;;  %vm130_vm3 = vcmp.ge.s32.totalorder %v44_v14, 64  ;;  %vm131_vm4 = vcmp.lt.s32.totalorder %v44_v14, 96  ;;  %v548_v58 = vld [vmem:[%s798_s6 + $0x8] sm:$0xff]  ;;  %s436_s2 = sshll.u32 %s608_s25, 4  ;;  %s438_s28 = sshll.u32 %s803_s11, 4  ;;  %s437_s2 = int_to_ptr.vmem [resolvable:$true] %s436_s2  ;;  %s439_s28 = int_to_ptr.hbm [resolvable:$true] %s438_s28 }
   0x8   :  { %v129_v18 = vld [vmem:[%s793_s1] sm:$0xff]  ;;  %vm719_vm5 = vmand %vm130_vm3, %vm131_vm4  ;;  %v546_v59 = vld [vmem:[%s796_s4 + $0x8] sm:$0xff]  ;;  %283 = vmatpush.bf16.msra.mxu3 %v548_v58 }
   0x9   :  { %v140_v19 = vpack.c.bf16 %v129_v18, %v129_v18  ;;  %230 = vrot.lane.b32.xlu1 %v129_v18, %s603_s0  ;;  %v560_v26 = vld [vmem:[%s799_s7] ss:$0 sm:$0xff]  ;;  %v728_v30 = vsel %vm719_vm5, 2.0, %v604_v29  ;;  %v733_v47 = vsel %vm719_vm5, -1.0, %v605_v46  ;;  %s607_s7 = smov 32  }
   0xa   :  { %118 = vmatpush.bf16.msra.mxu0 %v538_v4  ;;  %168 = vmatpush.bf16.msra.mxu1 %v543_v12  ;;  %v547_v60 = vld [vmem:[%s798_s6] sm:$0xff] }
   0xb   :  { %196 = vmatpush.bf16.msra.mxu2 %v541_v17  ;;  %v545_v61 = vld [vmem:[%s796_s4] sm:$0xff] }
   0xc   :  { %284 = vmatpush.bf16.msra.mxu3 %v547_v60  ;;  %v562_v46 = vld [vmem:[%s802_s10] ss:$0 sm:$0xff] }
   0xd   :  { %494 = vmatmul.msk.bf16.vlgmr.msra.gmra.mxu1 %vm157_vm2, %v140_v19 }
   0xe   :  { %119 = vmatpush.bf16.msra.mxu0 %v537_v5  ;;  %314 = vmatpush.bf16.msrb.mxu1 %v546_v59  ;;  %v561_v5 = vld [vmem:[%s800_s8] ss:$0 sm:$0xff] }
  0x12   :  { %120 = vmatpush.bf16.msra.mxu0 %v536_v6  ;;  %315 = vmatpush.bf16.msrb.mxu1 %v545_v61 }
  0x16   :  { %121 = vmatpush.bf16.msra.mxu0 %v535_v7 }
  0x1a   :  { %122 = vmatpush.bf16.msra.mxu0 %v534_v8 }
  0x1e   :  { %123 = vmatpush.bf16.msra.mxu0 %v533_v9 }
  0x74   :  { %v47_v15 = vpop.permute.xlu0 %46 }
  0x75   :  { %vm48_vm0 = vcmp.eq.s32.totalorder %v44_v14, %v47_v15 }
  0x76   :  { %vm484_vm1 = vmpackc.low %vm48_vm0, %vm48_vm0 }
  0x77   :  { %485 = vmatmul.msk.bf16.vlgmr.msra.gmra.mxu0 %vm484_vm1, %v602_v16 }
  0x7b   :  { %v231_v53 = vpop.permute.xlu1 %230 }
  0x8a   :  { %v170_v23 = vpop.f32.mrf.mxu1 }
  0x92   :  { %v172_v24 = vpop.f32.mrf.mxu1 }
  0xf4   :  { %v125_v20 = vpop.f32.mrf.mxu0 }
  0xf5   :  { %v135_v21 = vpack.c.bf16 %v125_v20, %v125_v20 }
  0xf7   :  { %503 = vmatmul.msk.bf16.vlgmr.msra.gmra.mxu2 %vm157_vm2, %v135_v21 }
  0xfc   :  { %v127_v22 = vpop.f32.mrf.mxu0 }
 0x17a   :  { %v198_v27 = vpop.f32.mrf.mxu2 }
 0x17b   :  { %v199_v28 = vadd.f32 %v198_v27, %v170_v23 }
 0x17d   :  { %v206_v31 = vadd.f32 %v560_v26, %v199_v28 }
 0x17f   :  { %v207_v32 = vmul.f32 %v206_v31, %v728_v30 }
 0x181   :  { %v504_v33 = vmul.f32 -1.442695, %v207_v32 }
 0x182   :  { %v200_v34 = vpop.f32.mrf.mxu2 }
 0x183   :  { %563 = vpow2.f32 %v504_v33  ;;  %v549_v34 = vld [vmem:[%s801_s9] sm:$0xff] }
 0x189   :  { %v564_v35 = vpop.eup %563 }
 0x18a   :  { %v211_v36 = vadd.f32 1.0, %v564_v35 }
 0x18c   :  { %565 = vrcp.f32 %v211_v36  ;;  %v223_v40 = vand.u32 2147483648, %v211_v36  ;;  %v221_v42 = vand.u32 2147483647, %v211_v36  ;;  %vm217_vm7 = vweird.f32 %v211_v36 }
 0x18e   :  { %v224_v44 = vor.u32 1.1754944e-38, %v223_v40  ;;  %vm222_vm9 = vcmp.eq.f32.partialorder %v221_v42, 8.507059e+37 }
 0x192   :  { %v566_v37 = vpop.eup %565 }
 0x193   :  { %v213_v38 = vmul.f32 %v566_v37, %v211_v36  ;;  %vm218_vm6 = vweird.f32 %v566_v37 }
 0x194   :  { %vm219_vm8 = vmor %vm217_vm7, %vm218_vm6 }
 0x195   :  { %v214_v39 = vsub.f32 1.0, %v213_v38 }
 0x197   :  { %v215_v41 = vmul.f32 %v566_v37, %v214_v39 }
 0x199   :  { %v216_v43 = vadd.f32 %v566_v37, %v215_v41 }
 0x19b   :  { %v220_v45 = vsel %vm219_vm8, %v566_v37, %v216_v43 }
 0x19c   :  { %v225_v48 = vsel %vm222_vm9, %v224_v44, %v220_v45 }
 0x19d   :  { %v227_v49 = vmul.f32 %v225_v48, %v728_v30 }
 0x19f   :  { %v228_v50 = vadd.f32 %v227_v49, %v733_v47 }
 0x1a1   :  { %235 = vrot.lane.b32.xlu0 %v228_v50, %s606_s5  ;;  %v233_v54 = vmul.f32 %v231_v53, %v228_v50 }
 0x213   :  { %v236_v51 = vpop.permute.xlu0 %235 }
 0x214   :  { %v238_v52 = vmul.f32 %v236_v51, %v228_v50 }
 0x216   :  { %240 = vrot.lane.b32.xlu1 %v238_v52, %s607_s7 }
 0x288   :  { %v241_v55 = vpop.permute.xlu1 %240 }
 0x289   :  { %v739_v56 = vadd.f32 %v241_v55, %v233_v54 }
 0x28b   :  { %567 = vtanh.f32 %v739_v56 }
 0x291   :  { %v568_v57 = vpop.eup %567 }
 0x292   :  { %246 = vrot.lane.b32.xlu2 %v568_v57, %s606_s5 }
 0x29a   :  { %260 = vrot.lane.b32.xlu2 %v140_v19, %s603_s0 }
 0x2a2   :  { %348 = vrot.lane.b32.xlu2 %v129_v18, %s606_s5 }
 0x2ec   :  { %v247_v62 = vpop.permute.xlu2 %246 }
 0x2ed   :  { %v249_v63 = vmul.f32 %v247_v62, %v228_v50 }
 0x2ef   :  { %v250_v0 = vpack.c.bf16 %v249_v63, %v249_v63 }
 0x2f1   :  { %291 = vrot.lane.b32.xlu0 %v250_v0, %s607_s7 }
 0x2f4   :  { %v261_v1 = vpop.permute.xlu2 %260 }
 0x2f5   :  { %513 = vmatmul.msk.bf16.vlgmr.msra.gmra.mxu3 %vm157_vm2, %v261_v1 }
 0x2fc   :  { %v349_v28 = vpop.permute.xlu2 %348 }
 0x363   :  { %v292_v2 = vpop.permute.xlu0 %291 }
 0x364   :  { %522 = vmatmul.msk.bf16.vlgmr.msrb.gmra.mxu1 %vm157_vm2, %v292_v2 }
 0x378   :  { %v286_v3 = vpop.f32.mrf.mxu3 }
 0x380   :  { %v288_v4 = vpop.f32.mrf.mxu3 }
 0x3e1   :  { %v317_v6 = vpop.f32.mrf.mxu1 }
 0x3e2   :  { %v318_v7 = vadd.f32 %v317_v6, %v286_v3 }
 0x3e4   :  { %v325_v8 = vadd.f32 %v561_v5, %v318_v7 }
 0x3e6   :  { %v326_v9 = vmul.f32 %v325_v8, %v728_v30 }
 0x3e8   :  { %v523_v10 = vmul.f32 -1.442695, %v326_v9 }
 0x3e9   :  { %v319_v11 = vpop.f32.mrf.mxu1 }
 0x3ea   :  { %569 = vpow2.f32 %v523_v10 }
 0x3f0   :  { %v570_v12 = vpop.eup %569 }
 0x3f1   :  { %v330_v13 = vadd.f32 1.0, %v570_v12 }
 0x3f3   :  { %571 = vrcp.f32 %v330_v13  ;;  %v342_v17 = vand.u32 2147483648, %v330_v13  ;;  %v340_v19 = vand.u32 2147483647, %v330_v13  ;;  %vm336_vm11 = vweird.f32 %v330_v13 }
 0x3f5   :  { %v343_v21 = vor.u32 1.1754944e-38, %v342_v17  ;;  %vm341_vm13 = vcmp.eq.f32.partialorder %v340_v19, 8.507059e+37 }
 0x3f9   :  { %v572_v14 = vpop.eup %571 }
 0x3fa   :  { %v332_v15 = vmul.f32 %v572_v14, %v330_v13  ;;  %vm337_vm10 = vweird.f32 %v572_v14 }
 0x3fb   :  { %vm338_vm12 = vmor %vm336_vm11, %vm337_vm10 }
 0x3fc   :  { %v333_v16 = vsub.f32 1.0, %v332_v15 }
 0x3fe   :  { %v334_v18 = vmul.f32 %v572_v14, %v333_v16 }
 0x400   :  { %v335_v20 = vadd.f32 %v572_v14, %v334_v18 }
 0x402   :  { %v339_v22 = vsel %vm338_vm12, %v572_v14, %v335_v20 }
 0x403   :  { %v344_v23 = vsel %vm341_vm13, %v343_v21, %v339_v22 }
 0x404   :  { %v346_v24 = vmul.f32 %v344_v23, %v728_v30  ;;  %v550_v30 = vld [vmem:[%s801_s9 + $0x8] sm:$0xff] }
 0x405   :  { %423 = vmatpush.bf16.msrb.mxu2 %v550_v30 }
 0x406   :  { %v347_v25 = vadd.f32 %v346_v24, %v733_v47 }
 0x408   :  { %353 = vrot.lane.b32.xlu1 %v347_v25, %s606_s5  ;;  %v351_v29 = vmul.f32 %v349_v28, %v347_v25 }
 0x409   :  { %424 = vmatpush.bf16.msrb.mxu2 %v549_v34 }
 0x47a   :  { %v354_v26 = vpop.permute.xlu1 %353 }
 0x47b   :  { %v356_v27 = vmul.f32 %v354_v26, %v347_v25 }
 0x47d   :  { %358 = vrot.lane.b32.xlu0 %v356_v27, %s607_s7 }
 0x485   :  { %370 = vrot.lane.b32.xlu0 %v249_v63, %s607_s7 }
 0x4ef   :  { %v359_v31 = vpop.permute.xlu0 %358 }
 0x4f0   :  { %v361_v32 = vadd.f32 %v359_v31, %v351_v29 }
 0x4f2   :  { %573 = vtanh.f32 %v361_v32  ;;  %382 = vrot.lane.b32.xlu0 %v361_v32, %s606_s5 }
 0x4f7   :  { %v371_v39 = vpop.permute.xlu0 %370 }
 0x4f8   :  { %v574_v33 = vpop.eup %573 }
 0x4f9   :  { %364 = vrot.lane.b32.xlu1 %v574_v33, %s606_s5 }
 0x564   :  { %v383_v43 = vpop.permute.xlu0 %382 }
 0x56b   :  { %v365_v35 = vpop.permute.xlu1 %364 }
 0x56c   :  { %v367_v36 = vmul.f32 %v365_v35, %v347_v25 }
 0x56e   :  { %v368_v37 = vpack.c.bf16 %v367_v36, %v367_v36  ;;  %374 = vrot.lane.b32.xlu1 %v367_v36, %s606_s5 }
 0x570   :  { %400 = vrot.lane.b32.xlu2 %v368_v37, %s607_s7 }
 0x578   :  { %378 = vrot.lane.b32.xlu2 %v739_v56, %s607_s7 }
 0x5ca   :  { %v401_v38 = vpop.permute.xlu2 %400 }
 0x5cb   :  { %532 = vmatmul.msk.bf16.vlgmr.msrb.gmra.mxu2 %vm157_vm2, %v401_v38 }
 0x5d2   :  { %v379_v41 = vpop.permute.xlu2 %378 }
 0x5e0   :  { %v375_v40 = vpop.permute.xlu1 %374 }
 0x5e1   :  { %v385_v42 = vsel %vm157_vm2, %v371_v39, %v375_v40 }
 0x5e2   :  { %v387_v44 = vsel %vm386_vm14, %v385_v42, %v379_v41 }
 0x5e3   :  { %v389_v45 = vsel %vm388_vm15, %v387_v44, %v383_v43 }
 0x5e4   :  { %390 = vst [vmem:[%s804_s12] sm:$0xff] %v389_v45 }
 0x64e   :  { %v426_v47 = vpop.f32.mrf.mxu2 }
 0x64f   :  { %v427_v48 = vadd.f32 %v562_v46, %v426_v47 }
 0x651   :  { %430 = vst [vmem:[#allocation2] sm:$0xff] %v427_v48 }
 0x652   :  { %441 = dma.vmem_to_hbm [thread:$0]  %s437_s2, 128, %s439_s28, [#allocation3]  }
 0x656   :  { %v428_v49 = vpop.f32.mrf.mxu2 }
 0x657   :  { %599 = dma.done.wait [#allocation3], 128  }
 0x658   :  { %600 = vsyncadd [#allocation3], 4294967168 }
 0x659   :  { %450 = vsyncpa [#allocation3], 1 }

</bundles_post_ra>
